<compile_context>
chip_gen: v5e
topology: v5e:2x2
jax: 0.10.0
libtpu: 0.0.40
codegen_flags: <defaults>
</compile_context>

<pallas_src>
import functools

import jax
import jax.numpy as jnp
from jax.experimental import pallas as pl
from jax.experimental.pallas import tpu as pltpu


def _pixel_norm_kernel(x_ref, o_ref, *, inv_c, eps, bf16_mul):
    # Block view: (C, TILE_HW) -- batch dim squeezed out by the BlockSpec.
    # Read #1 of the resident VMEM tile: f32 sum of squares.  Not bound to a
    # reusable f32 temp, so the full-block f32 upcast is never materialized.
    ssq = jnp.sum(jnp.square(x_ref[...].astype(jnp.float32)),
                  axis=0, keepdims=True)                 # (1, TILE_HW), sublane reduce
    scale = jax.lax.rsqrt(ssq * inv_c + eps)             # 1/C folded in; rsqrt on EUP
    if bf16_mul:
        # v6e/v7x bf16 path: f32-accurate scale applied as a packed bf16 multiply
        # (no full-tensor upcast/downcast -> ~half the VALU work per element).
        o_ref[...] = x_ref[...] * scale.astype(o_ref.dtype)
    else:
        # Read #2 of the resident tile (vld is cheap: 3 load slots / cycle).
        o_ref[...] = (x_ref[...].astype(jnp.float32) * scale).astype(o_ref.dtype)


def _device_kind():
    try:
        return jax.devices()[0].device_kind.lower()
    except Exception:  # pragma: no cover - CPU / interpret fallbacks
        return ""


def _choose_tile_hw(C, HW, N, itemsize, target_block_bytes):
    """Lane-dense (multiple-of-128) HW tile.

    Big enough to stream efficiently (~target_block_bytes per block), small
    enough that the grid has >= ~8 steps so the BlockSpec pipeline overlaps
    in/out DMA with compute and v7x's two TensorCores both get work.
    """
    if HW < 128:
        return HW  # last-dim block must equal the full extent when < 128
    hw128 = (HW // 128) * 128
    budget_cols = (target_block_bytes // max(1, C * itemsize)) // 128 * 128
    tile = max(128, min(hw128, budget_cols))
    MIN_STEPS = 8
    while N * pl.cdiv(HW, tile) < MIN_STEPS and tile > 256:
        tile = max(256, ((tile // 2) // 128) * 128)
    return tile


def pixel_norm(x, *, dim=1, eps=1e-8):
    """Pixel-wise feature normalization over `dim` (channel dim of NCHW input)."""
    assert dim == 1, "This kernel implements the standard StyleGAN case: dim=1 (channels)."
    N, C, H, W = x.shape
    HW = H * W
    x2d = x.reshape(N, C, HW)

    kind = _device_kind()
    is_v7 = "v7" in kind
    # bf16 VALU exists on v6e/v7x; keep f32 math on v5e and older.
    bf16_mul = (x.dtype == jnp.bfloat16) and (("v6" in kind) or is_v7)

    # ~4 MiB blocks; 2 bufs x (in + out) = 16 MiB fits every generation's limit below.
    target_block_bytes = 4 << 20
    # v7x has 64 MiB VMEM per TC -> cap scoped limit at 48 MiB; v5e/v6e have 128 MiB
    # physical but a small default scoped limit, so raise it explicitly to 64 MiB.
    vmem_limit_bytes = (48 << 20) if is_v7 else (64 << 20)

    tile_hw = _choose_tile_hw(C, HW, N, x.dtype.itemsize, target_block_bytes)
    grid = (N, pl.cdiv(HW, tile_hw))

    out = pl.pallas_call(
        functools.partial(_pixel_norm_kernel,
                          inv_c=1.0 / C, eps=float(eps), bf16_mul=bf16_mul),
        out_shape=jax.ShapeDtypeStruct((N, C, HW), x.dtype),
        grid_spec=pltpu.PrefetchScalarGridSpec(
            num_scalar_prefetch=0,
            grid=grid,
            # Never tile C: the channel mean must see the full channel extent per block.
            in_specs=[pl.BlockSpec((None, C, tile_hw), lambda i, j: (i, 0, j))],
            out_specs=pl.BlockSpec((None, C, tile_hw), lambda i, j: (i, 0, j)),
        ),
        compiler_params=pltpu.CompilerParams(
            dimension_semantics=("parallel", "parallel"),
            vmem_limit_bytes=vmem_limit_bytes),
    )(x2d)

    return out.reshape(N, C, H, W)


def _reference(x, eps):
    xf = x.astype(jnp.float32)
    scale = jax.lax.rsqrt(jnp.mean(jnp.square(xf), axis=1, keepdims=True) + eps)
    return (xf * scale).astype(x.dtype)


if __name__ == "__main__":
    eps = 1e-8

    # Small shape consistent with the module's forward (NCHW, dim=1).
    x = jax.random.normal(jax.random.PRNGKey(0), (2, 4, 16, 16), dtype=jnp.float32)
    y = jax.block_until_ready(pixel_norm(x, dim=1, eps=eps))
    assert y.shape == x.shape and y.dtype == x.dtype
    assert jnp.allclose(y, _reference(x, eps), atol=1e-5, rtol=1e-5), "f32 mismatch"

    # StyleGAN-ish shape exercising the multi-tile (>=8-step) HW-tiled path.
    xb = jax.random.normal(jax.random.PRNGKey(1), (1, 512, 64, 64), dtype=jnp.float32)
    yb = jax.block_until_ready(pixel_norm(xb, dim=1, eps=eps))
    assert jnp.allclose(yb, _reference(xb, eps), atol=1e-5, rtol=1e-5), "tiled f32 mismatch"

    # bf16 I/O path (bf16 scale-multiply on v6e/v7x, f32 math kept on v5e).
    xh = xb.astype(jnp.bfloat16)
    yh = jax.block_until_ready(pixel_norm(xh, dim=1, eps=eps))
    assert yh.dtype == jnp.bfloat16
    assert jnp.allclose(yh.astype(jnp.float32),
                        _reference(xh, eps).astype(jnp.float32),
                        atol=3e-2, rtol=3e-2), "bf16 mismatch"

    print("KERNEL_OK")
</pallas_src>

<mosaic_0001>
module attributes {stable_mosaic.version = 11 : i64} {
  func.func @_pixel_norm_kernel(%arg0: i32, %arg1: i32, %arg2: memref<1x4x256xf32, #tpu.memory_space<vmem>>, %arg3: memref<1x4x256xf32, #tpu.memory_space<vmem>>) attributes {dimension_semantics = [#tpu.dimension_semantics<parallel>, #tpu.dimension_semantics<parallel>], iteration_bounds = array<i64: 2, 1>, scalar_prefetch = 0 : i64, scratch_operands = 0 : i64, tpu.core_type = #tpu.core_type<tc>, window_params = [{transform_indices = @transform_0, window_bounds = array<i64: 1, 4, 256>}, {transform_indices = @transform_1, window_bounds = array<i64: 1, 4, 256>}]} {
    %c0 = arith.constant 0 : index
    %c0_0 = arith.constant 0 : index
    %c0_1 = arith.constant 0 : index
    %0 = vector.load %arg2[%c0, %c0_0, %c0_1] : memref<1x4x256xf32, #tpu.memory_space<vmem>>, vector<1x4x256xf32>
    %1 = vector.shape_cast %0 : vector<1x4x256xf32> to vector<4x256xf32>
    %2 = arith.mulf %1, %1 : vector<4x256xf32>
    %cst = arith.constant dense<0.000000e+00> : vector<256xf32>
    %3 = vector.multi_reduction <add>, %2, %cst [0] : vector<4x256xf32> to vector<256xf32>
    %4 = vector.shape_cast %3 : vector<256xf32> to vector<1x256xf32>
    %cst_2 = arith.constant 2.500000e-01 : f32
    %5 = vector.broadcast %cst_2 : f32 to vector<1x256xf32>
    %6 = arith.mulf %4, %5 : vector<1x256xf32>
    %cst_3 = arith.constant 9.99999993E-9 : f32
    %7 = vector.broadcast %cst_3 : f32 to vector<1x256xf32>
    %8 = arith.addf %6, %7 : vector<1x256xf32>
    %9 = math.rsqrt %8 : vector<1x256xf32>
    %c0_4 = arith.constant 0 : index
    %c0_5 = arith.constant 0 : index
    %c0_6 = arith.constant 0 : index
    %10 = vector.load %arg2[%c0_4, %c0_5, %c0_6] : memref<1x4x256xf32, #tpu.memory_space<vmem>>, vector<1x4x256xf32>
    %11 = vector.shape_cast %10 : vector<1x4x256xf32> to vector<4x256xf32>
    %12 = vector.broadcast %9 : vector<1x256xf32> to vector<4x256xf32>
    %13 = arith.mulf %11, %12 : vector<4x256xf32>
    %c0_7 = arith.constant 0 : index
    %c0_8 = arith.constant 0 : index
    %c0_9 = arith.constant 0 : index
    %14 = vector.load %arg3[%c0_7, %c0_8, %c0_9] : memref<1x4x256xf32, #tpu.memory_space<vmem>>, vector<1x4x256xf32>
    %15 = vector.shape_cast %14 : vector<1x4x256xf32> to vector<4x256xf32>
    %16 = vector.shape_cast %13 : vector<4x256xf32> to vector<1x4x256xf32>
    tpu.vector_store %arg3[%c0_7, %c0_8, %c0_9], %16 {strides = array<i32>} : memref<1x4x256xf32, #tpu.memory_space<vmem>>, vector<1x4x256xf32>,
    return
  }
  func.func @transform_0(%arg0: i32, %arg1: i32) -> (i32, i32, i32) {
    %c0_i32 = arith.constant 0 : i32
    %c0_i32_0 = arith.constant 0 : i32
    return %arg0, %c0_i32, %arg1 : i32, i32, i32
  }
  func.func @transform_1(%arg0: i32, %arg1: i32) -> (i32, i32, i32) {
    %c0_i32 = arith.constant 0 : i32
    %c0_i32_0 = arith.constant 0 : i32
    return %arg0, %c0_i32, %arg1 : i32, i32, i32
  }
}

</mosaic_0001>

<bundles_post_ra>
// kernel: tpu_custom_call.1
= control target key start
LH: loop header
LB: loop body
LE: loop exit
PB: predicated region body
PF: predicated region fallthrough
CT: control target
= control target key end

     0   :  { %6 = vsyncpa [#allocation3], 0  ;;  %s646_s0 = inlined_call_operand.hbm [shape: f32[2,4,256], index: 0, kind: input, shape index: {}]   ;;  %s647_s1 = inlined_call_operand.hbm [shape: f32[2,4,256], index: 1, kind: output, shape index: {}]  }
   0x1   :  { %8 = vsyncpa [#allocation3 + $0x1], 0 }
   0x2   :  { %9 = vsyncpa [#allocation4], 0 }
   0x3   :  { %11 = vsyncpa [#allocation4 + $0x1], 0  ;;  %s519_s6 = smov 0   ;;  %s521_s7 = smov 0  }
   0x4   :  { %s523_s8 = smov 0   ;;  %s525_s9 = smov 0  }
   0x5   :  { %s527_s10 = smov 0   ;;  %s529_s11 = smov 0  }
   0x6 LB: > { %s312_s12 = sadd.s32 4294967295, %s507_s11   ;;  %s313_s13 = sadd.s32 4294967294, %s507_s11   ;;  %s507_s11 = sphi %s529_s11, %s17_s11   ;;  %s503_s10 = sphi %s527_s10, %s656_s10   ;;  %s499_s9 = sphi %s525_s9, %s655_s9   ;;  %s495_s8 = sphi %s523_s8, %s654_s8   ;;  %s491_s7 = sphi %s521_s7, %s653_s7   ;;  %s487_s6 = sphi %s519_s6, %s652_s6  }
   0x7   : > { %s29_s14 = sadd.s32 1, %s503_s10  ;;  %s38_s15 = sadd.s32 1, %s495_s8 }
   0x8   : > { %p31_p0 = scmp.ge.s32.totalorder %s29_s14, 2  ;;  %p45_p1 = scmp.ne.s32.totalorder %s495_s8, %s491_s7 }
   0x9   : > { %p46_p2 = scmp.eq.s32.totalorder %s507_s11, 0  ;;  %p51_p3 = scmp.ne.s32.totalorder %s491_s7, %s487_s6 }
   0xa   : > { %s658_s14 = smov (%p31_p0, %s29_s14), 0  ;;  %p52_p5 = scmp.eq.s32.totalorder %s312_s12, 0 }
   0xb   : > { %p560_p4 = por %p46_p2, %p45_p1  ;;  %s33_s17 = ssub.s32 %s503_s10, %s658_s14 }
   0xc   : > { %p77_p6 = scmp.eq.s32.totalorder %s312_s12, 1  ;;  %p36_p7 = scmp.eq.s32.totalorder %s33_s17, 0 }
   0xd   : > { %p566_p8 = por %p52_p5, %p51_p3  ;;  %p83_p10 = scmp.eq.s32.totalorder %s313_s13, 1 }
   0xe   : > { %p570_p9 = por %p77_p6, %p45_p1  ;;  %p315_p12 = scmp.ge.s32.totalorder %s507_s11, 2 }
   0xf   : > { %s575_s20 = scalar_select %p36_p7, %s495_s8, %s38_s15  }
  0x10   : > { %p577_p11 = por %p83_p10, %p51_p3  ;;  %p341_p13 = scmp.lt.s32.totalorder %s507_s11, 2 }
  0x11   : > { %s103_s22 = sand.u32 1, %s495_s8   ;;  %s327_s24 = sshll.u32 %s503_s10, 3 }
  0x12   : > { %s316_s23 = sshll.u32 %s103_s22, 3  ;;  %s114_s27 = scalar_lea.hbm %s646_s0, %s327_s24 }
  0x13   : > { %s107_s28 = scalar_lea.vmem [#allocation2], %s316_s23  ;;  %s116_s30 = sshll.u32 %s114_s27, 4  ;;  %s117_s30 = int_to_ptr.hbm [resolvable:$true] %s116_s30 }
  0x14   : > { %s118_s29 = sshll.u32 %s107_s28, 4  ;;  %p334_p0 = pnand %p341_p13, %p560_p4  ;;  %s119_s29 = int_to_ptr.vmem [resolvable:$true] %s118_s29 }
  0x15   : > { %p319_p1 = scmp.ge.s32.totalorder %s507_s11, 1  ;;  %p123_p2 = scmp.lt.s32.totalorder %s507_s11, 3 }
  0x16   : > { %s104_s2 = scalar_lea.sflag [#allocation3], %s103_s22 }
  0x17   : > { %336 = dma.hbm_to_vmem [thread:$0]  (!%p334_p0), %s117_s30, 128, %s119_s29, %s104_s2  }
  0x18   : > { %p124_p3 = pnand %p319_p1, %p123_p2 }
  0x19   : > { %s593_s3 = sand.u32 (!%p124_p3), 1, %s491_s7  }
  0x1a   : > { %127 = sbr.rel (%p124_p3) target bundleno = 87 (0x57), region = 24  ;;  %s320_s4 = sshll.u32 (!%p124_p3), %s593_s3, 3 }
  0x1b   : > { %s130_s5 = scalar_lea.sflag (!%p124_p3), [#allocation3], %s593_s3  ;;  %s133_s12 = scalar_lea.vmem (!%p124_p3), [#allocation2], %s320_s4 }
  0x1f   : > { %478 = dma.done.wait (%p566_p8), %s130_s5, 128  }
  0x20   : > { %480 = vsyncadd (%p566_p8), %s130_s5, 4294967168  ;;  %v155_v0 = vld [vmem:[%s133_s12] sm:$0xff]  ;;  %vm163_vm0 = vcmask 1043456   ;;  %s328_s13 = sshll.u32 %s499_s9, 3  ;;  %s152_s18 = scalar_lea.vmem [#allocation5], %s320_s4 }
  0x21   : > { %v156_v1 = vmul.f32 %v155_v0, %v155_v0  ;;  %s223_s17 = scalar_lea.hbm %s647_s1, %s328_s13  ;;  %s225_s9 = sshll.u32 %s152_s18, 4  ;;  %s226_s9 = int_to_ptr.vmem [resolvable:$true] %s225_s9 }
  0x22   : > { %s227_s22 = sshll.u32 %s223_s17, 4  ;;  %s210_s23 = scalar_lea.sflag [#allocation4], %s593_s3  ;;  %s228_s22 = int_to_ptr.hbm [resolvable:$true] %s227_s22 }
  0x23   : > { %158 = vst [vmem:[#allocation1] ss:$2 sm:$0xff] %v156_v1  ;;  %s439_s24 = sshra.s32 %s228_s22, 4  ;;  %s445_s28 = scalar_lea.hbm %s647_s1, 16  ;;  %s440_s24 = int_to_ptr.hbm [resolvable:$true] %s439_s24 }
  0x24   : > { %s441_s25 = scalar_lea.hbm %s440_s24, 8  ;;  %p446_p7 = scmp.lt.s32.totalorder %s440_s24, %s647_s1 }
  0x25   : > { %p442_p4 = scmp.ne.s32.totalorder %s440_s24, %s441_s25  ;;  %p447_p8 = scmp.lt.s32.totalorder %s445_s28, %s441_s25 }
  0x27   : > { %p443_p5 = pnand %p442_p4, %p570_p9  ;;  %p448_p10 = por %p447_p8, %p446_p7 }
  0x29   : > { %p444_p6 = pneg %p443_p5 }
  0x2a   : > { %v159_v2 = vld.sshfl [vmem:[#allocation1] sm:$0xff pattern:$0x75316420]  ;;  %v160_v3 = vld.sshfl [vmem:[#allocation1 + $0x8] sm:$0xff pattern:$0x75316420] }
  0x2b   : > { %v164_v4 = vsel %vm163_vm0, %v159_v2, 0.0  ;;  %v171_v5 = vsel %vm163_vm0, %v160_v3, 0.0  ;;  %p449_p13 = pnand %p448_p10, %p444_p6 }
  0x2c   : > { %v165_v6 = vrot.slane %v164_v4, 4  ;;  %v172_v7 = vrot.slane %v171_v5, 4 }
  0x2e   : > { %v166_v8 = vadd.f32 %v165_v6, %v164_v4  ;;  %v173_v9 = vadd.f32 %v172_v7, %v171_v5 }
  0x30   : > { %v167_v10 = vrot.slane %v166_v8, 2  ;;  %v174_v11 = vrot.slane %v173_v9, 2 }
  0x32   : > { %v168_v12 = vadd.f32 %v167_v10, %v166_v8  ;;  %v175_v13 = vadd.f32 %v174_v11, %v173_v9 }
  0x34   : > { %v169_v14 = vrot.slane %v168_v12, 1  ;;  %v176_v15 = vrot.slane %v175_v13, 1 }
  0x36   : > { %v170_v16 = vadd.f32 %v169_v14, %v168_v12  ;;  %v177_v17 = vadd.f32 %v176_v15, %v175_v13 }
  0x38   : > { %v178_v18 = vmul.f32 0.25, %v170_v16  ;;  %v179_v19 = vmul.f32 0.25, %v177_v17 }
  0x3a   : > { %v180_v20 = vadd.f32 1e-08, %v178_v18  ;;  %v181_v21 = vadd.f32 1e-08, %v179_v19 }
  0x3c   : > { %391 = vrsqrt.f32 %v180_v20  ;;  %vm198_vm3 = vweird.f32 %v181_v21  ;;  %vm188_vm5 = vweird.f32 %v180_v20 }
  0x3d   : > { %393 = vrsqrt.f32 %v181_v21 }
  0x42   : > { %v392_v22 = vpop.eup %391 }
  0x43   : > { %v394_v23 = vpop.eup %393  ;;  %v183_v24 = vmul.f32 %v392_v22, %v180_v20  ;;  %vm189_vm2 = vweird.f32 %v392_v22 }
  0x44   : > { %v193_v25 = vmul.f32 %v394_v23, %v181_v21  ;;  %vm199_vm1 = vweird.f32 %v394_v23  ;;  %vm190_vm6 = vmor %vm188_vm5, %vm189_vm2 }
  0x45   : > { %v184_v26 = vmul.f32 %v392_v22, %v183_v24  ;;  %vm200_vm4 = vmor %vm198_vm3, %vm199_vm1 }
  0x46   : > { %v194_v27 = vmul.f32 %v394_v23, %v193_v25 }
  0x47   : > { %v185_v28 = vmul.f32 0.5, %v184_v26 }
  0x48   : > { %v195_v29 = vmul.f32 0.5, %v194_v27 }
  0x49   : > { %v186_v30 = vsub.f32 1.5, %v185_v28 }
  0x4a   : > { %v196_v31 = vsub.f32 1.5, %v195_v29 }
  0x4b   : > { %v187_v32 = vmul.f32 %v392_v22, %v186_v30 }
  0x4c   : > { %v197_v33 = vmul.f32 %v394_v23, %v196_v31 }
  0x4d   : > { %v191_v36 = vsel %vm190_vm6, %v392_v22, %v187_v32 }
  0x4e   : > { %v201_v34 = vsel %vm200_vm4, %v394_v23, %v197_v33 }
  0x4f   : > { %v204_v35 = vrot.slane %v201_v34, 4 }
  0x51   : > { %v205_v37 = vsel %vm163_vm0, %v191_v36, %v204_v35 }
  0x52   : > { %v207_v38 = vmul.f32 %v205_v37, %v155_v0 }
  0x54   : > { %208 = vst [vmem:[%s152_s18] sm:$0xff] %v207_v38 }
  0x55   : > { %452 = shalt.err (!%p449_p13)
}
  0x56   : > { %331 = dma.vmem_to_hbm [thread:$0]  (%p570_p9), %s226_s9, 128, %s228_s22, %s210_s23  }
  0x57 PF: > { %s239_s2 = sand.u32 1, %s487_s6   ;;  %p338_p0 = pnand %p315_p12, %p577_p11 }
  0x58   : > { %s240_s3 = scalar_lea.sflag [#allocation4], %s239_s2 }
  0x59   : > { %p339_p1 = pneg %p338_p0 }
  0x5b   : > { %482 = dma.done.wait (%p339_p1), %s240_s3, 128  }
  0x5c   : > { %484 = vsyncadd (%p339_p1), %s240_s3, 4294967168  ;;  %s17_s11 = sadd.s32 1, %s507_s11   ;;  %s652_s6 = smov %s491_s7 }
  0x5d   : > { %p14_p2 = scmp.ge.s32.totalorder %s17_s11, 4   ;;  %s653_s7 = smov %s495_s8 }
  0x5e   : > { %s654_s8 = smov %s575_s20  ;;  %s655_s9 = smov %s503_s10 }
  0x5f   : > { %s656_s10 = smov %s658_s14  ;;  %16 = sbr.rel (!%p14_p2) target bundleno = 6 (0x6), region = 69 }
  0x64   :  { %246 = vsyncpa [#allocation3], 1 }
  0x65   :  { %248 = vsyncpa [#allocation3 + $0x1], 1 }
  0x66   :  { %249 = vsyncpa [#allocation4], 1 }
  0x67   :  { %251 = vsyncpa [#allocation4 + $0x1], 1 }

</bundles_post_ra>
